<compile_context>
chip_gen: v7x
topology: tpu7x:2x2x1
jax: 0.10.0
libtpu: 0.0.40
codegen_flags: <defaults>
</compile_context>

<pallas_src>
import math

import jax
import jax.numpy as jnp
from jax.experimental import pallas as pl
from jax.experimental.pallas import tpu as pltpu


def _round_up(n, m):
    return ((n + m - 1) // m) * m


# ---------------------------------------------------------------------------
# Kernel
# ---------------------------------------------------------------------------
def _network_kernel(x_ref,
                    w1_ref, b1_ref,
                    w234_ref, b234_ref,
                    w5_ref, b5_ref,
                    w6_ref, b6_ref,
                    w7_ref, b7_ref,
                    wo_ref, bo_ref,
                    out_ref):
    bf16 = jnp.bfloat16

    x = x_ref[...].astype(bf16)

    # layer_1 + leaky_relu (torch default negative_slope = 0.01)
    z1 = jnp.dot(x, w1_ref[...], preferred_element_type=jnp.float32) + b1_ref[...]
    h1 = jnp.where(z1 > 0, z1, 0.01 * z1).astype(bf16)

    # fused layer_2 | layer_3 | layer_4  ->  [h2 | h3 | h4]  (3 x 256 cols)
    z234 = (jnp.dot(h1, w234_ref[...],
                    preferred_element_type=jnp.float32) + b234_ref[...])
    h234 = jnp.maximum(z234, 0.0).astype(bf16)

    # lane-aligned branch slices (offsets are multiples of 128)
    h2 = h234[:, 0:256]
    h3 = h234[:, 256:512]
    h4 = h234[:, 512:768]

    # three per-branch dots replacing the old 768x384 block-diagonal matmul
    z7 = jnp.dot(h4, w7_ref[...], preferred_element_type=jnp.float32) + b7_ref[...]
    z5 = jnp.dot(h2, w5_ref[...], preferred_element_type=jnp.float32) + b5_ref[...]
    z6 = jnp.dot(h3, w6_ref[...], preferred_element_type=jnp.float32) + b6_ref[...]

    h7v = jnp.maximum(z7, 0.0).astype(bf16)
    h5v = jnp.maximum(z5, 0.0).astype(bf16)
    h6v = jnp.maximum(z6, 0.0).astype(bf16)

    # concat order matches the torch.cat((h7, h5, h6), dim=1); wo rows are
    # packed in the same padded [h7 | h5 | h6] layout.
    hcat = jnp.concatenate([h7v, h5v, h6v], axis=1)

    out = (jnp.dot(hcat, wo_ref[...],
                   preferred_element_type=jnp.float32) + bo_ref[...])
    out_ref[...] = out.astype(out_ref.dtype)


# ---------------------------------------------------------------------------
# Wrapper
# ---------------------------------------------------------------------------
def _choose_tiling(B, tb):
    """Adaptive batch tile: minimal padding, >=2 grid steps for big batches."""
    n_tiles = max(1, math.ceil(B / tb))
    # v7x has 2 TensorCores sharded over the 'parallel' grid axis; make sure
    # big batches produce at least 2 grid steps (no-op cost on v5e/v6e).
    if B >= 256:
        n_tiles = max(n_tiles, 2)
    TB = _round_up(math.ceil(B / n_tiles), 8)
    Bp = n_tiles * TB
    return TB, Bp, n_tiles


def network_forward(x, packed, tb=1024):
    """x: (B, input_dimension) float32.  packed: output of pack_params()."""
    B, din = x.shape
    dout = packed["dout"]
    doutp = packed["wo"].shape[1]

    TB, Bp, n_tiles = _choose_tiling(B, tb)
    if Bp != B:
        x = jnp.pad(x, ((0, Bp - B), (0, 0)))
    grid = (n_tiles,)

    def full_spec(arr):
        shp = arr.shape
        return pl.BlockSpec(shp, lambda i, _s=shp: (0,) * len(_s))

    args = (x,
            packed["w1"], packed["b1"],
            packed["w234"], packed["b234"],
            packed["w5"], packed["b5"],
            packed["w6"], packed["b6"],
            packed["w7"], packed["b7"],
            packed["wo"], packed["bo"])

    out = pl.pallas_call(
        _network_kernel,
        out_shape=jax.ShapeDtypeStruct((Bp, doutp), jnp.float32),
        grid=grid,
        in_specs=[pl.BlockSpec((TB, din), lambda i: (i, 0))]
                 + [full_spec(a) for a in args[1:]],
        out_specs=pl.BlockSpec((TB, doutp), lambda i: (i, 0)),
        compiler_params=pltpu.CompilerParams(
            dimension_semantics=("parallel",),
            vmem_limit_bytes=32 * 1024 * 1024),
    )(*args)

    # Lane-dense padded output written by the kernel; slice to logical shape.
    # (Consumers that can work on the padded block can skip this slice.)
    return out[:B, :dout]


# ---------------------------------------------------------------------------
# Parameter init (logical, unpadded, f32) and packing (padded, fused, bf16)
# ---------------------------------------------------------------------------
def _xavier_uniform(key, fan_in, fan_out):
    bound = jnp.sqrt(6.0 / (fan_in + fan_out))
    # stored (in_features, out_features), i.e. transposed vs torch's (out, in)
    return jax.random.uniform(key, (fan_in, fan_out), jnp.float32, -bound, bound)


def _bias(key, fan_in, fan_out):
    # torch.nn.Linear default bias init: U(-1/sqrt(fan_in), 1/sqrt(fan_in))
    bound = 1.0 / jnp.sqrt(jnp.float32(fan_in))
    return jax.random.uniform(key, (1, fan_out), jnp.float32, -bound, bound)


def init_params(key, input_dimension, output_dimension):
    dims = [
        ("1", input_dimension, 200),
        ("2", 200, 200),
        ("3", 200, 200),
        ("4", 200, 200),
        ("5", 200, 100),
        ("6", 200, 100),
        ("7", 200, 100),
    ]
    params = {}
    keys = jax.random.split(key, 2 * len(dims) + 2)
    for i, (name, fi, fo) in enumerate(dims):
        params[f"w{name}"] = _xavier_uniform(keys[2 * i], fi, fo)
        params[f"b{name}"] = _bias(keys[2 * i + 1], fi, fo)
    params["wo"] = _xavier_uniform(keys[-2], 300, output_dimension)
    params["bo"] = _bias(keys[-1], 300, output_dimension)
    return params


def pack_params(p):
    """Pad to lane multiples, fuse parallel branches, cast weights to bf16."""
    f32, bf16 = jnp.float32, jnp.bfloat16
    din = p["w1"].shape[0]
    dout = p["wo"].shape[1]
    doutp = _round_up(max(dout, 1), 128)

    # layer_1: (din, 200) -> (din, 256)
    w1 = jnp.zeros((din, 256), f32).at[:, :200].set(p["w1"])
    b1 = jnp.zeros((1, 256), f32).at[:, :200].set(p["b1"])

    # layers 2/3/4 fused: (256, 3*256); column blocks [h2 | h3 | h4]
    w234 = jnp.zeros((256, 768), f32)
    w234 = w234.at[:200, 0:200].set(p["w2"])
    w234 = w234.at[:200, 256:456].set(p["w3"])
    w234 = w234.at[:200, 512:712].set(p["w4"])
    b234 = jnp.zeros((1, 768), f32)
    b234 = b234.at[:, 0:200].set(p["b2"])
    b234 = b234.at[:, 256:456].set(p["b3"])
    b234 = b234.at[:, 512:712].set(p["b4"])

    # per-branch layer_5/6/7 weights: (256, 128) each (dense, no block-diag)
    def branch(w, b):
        wp = jnp.zeros((256, 128), f32).at[:200, :100].set(w)
        bp = jnp.zeros((1, 128), f32).at[:, :100].set(b)
        return wp.astype(bf16), bp

    w5, b5 = branch(p["w5"], p["b5"])   # h2 -> h5
    w6, b6 = branch(p["w6"], p["b6"])   # h3 -> h6
    w7, b7 = branch(p["w7"], p["b7"])   # h4 -> h7

    # output layer: wo rows follow the padded concat layout [h7 | h5 | h6]
    wo = jnp.zeros((384, doutp), f32)
    wo = wo.at[0:100, :dout].set(p["wo"][0:100])      # h7 rows
    wo = wo.at[128:228, :dout].set(p["wo"][100:200])  # h5 rows
    wo = wo.at[256:356, :dout].set(p["wo"][200:300])  # h6 rows
    bo = jnp.zeros((1, doutp), f32).at[:, :dout].set(p["bo"])

    return {
        "w1": w1.astype(bf16), "b1": b1,
        "w234": w234.astype(bf16), "b234": b234,
        "w5": w5, "b5": b5,
        "w6": w6, "b6": b6,
        "w7": w7, "b7": b7,
        "wo": wo.astype(bf16), "bo": bo,
        "dout": dout,
    }


# ---------------------------------------------------------------------------
# Plain-JAX reference mirroring the PyTorch forward (f32, unfused)
# ---------------------------------------------------------------------------
def reference_forward(x, p):
    z1 = x @ p["w1"] + p["b1"]
    h1 = jnp.where(z1 > 0, z1, 0.01 * z1)
    h2 = jnp.maximum(h1 @ p["w2"] + p["b2"], 0.0)
    h3 = jnp.maximum(h1 @ p["w3"] + p["b3"], 0.0)
    h4 = jnp.maximum(h1 @ p["w4"] + p["b4"], 0.0)
    h5 = jnp.maximum(h2 @ p["w5"] + p["b5"], 0.0)
    h6 = jnp.maximum(h3 @ p["w6"] + p["b6"], 0.0)
    h7 = jnp.maximum(h4 @ p["w7"] + p["b7"], 0.0)
    cat = jnp.concatenate([h7, h5, h6], axis=1)
    return cat @ p["wo"] + p["bo"]


if __name__ == "__main__":
    key = jax.random.PRNGKey(0)
    k_param, k_x1, k_x2 = jax.random.split(key, 3)

    input_dimension = 32
    output_dimension = 8

    params = init_params(k_param, input_dimension, output_dimension)
    packed = pack_params(params)

    # small batch (single grid step)
    batch = 8
    x = jax.random.normal(k_x1, (batch, input_dimension), jnp.float32)
    out = jax.block_until_ready(network_forward(x, packed))
    ref = reference_forward(x, params)
    assert out.shape == (batch, output_dimension)
    assert jnp.allclose(out, ref, atol=3e-2, rtol=3e-2), (
        float(jnp.max(jnp.abs(out - ref))))

    # larger, non-divisible batch (exercises adaptive tiling + >=2 grid steps)
    batch2 = 600
    x2 = jax.random.normal(k_x2, (batch2, input_dimension), jnp.float32)
    out2 = jax.block_until_ready(network_forward(x2, packed))
    ref2 = reference_forward(x2, params)
    assert out2.shape == (batch2, output_dimension)
    assert jnp.allclose(out2, ref2, atol=3e-2, rtol=3e-2), (
        float(jnp.max(jnp.abs(out2 - ref2))))

    print("KERNEL_OK")
</pallas_src>

<mosaic_0001>
module attributes {stable_mosaic.version = 11 : i64} {
  func.func @_network_kernel(%arg0: i32, %arg1: memref<8x32xf32, #tpu.memory_space<vmem>>, %arg2: memref<32x256xbf16, #tpu.memory_space<vmem>>, %arg3: memref<1x256xf32, #tpu.memory_space<vmem>>, %arg4: memref<256x768xbf16, #tpu.memory_space<vmem>>, %arg5: memref<1x768xf32, #tpu.memory_space<vmem>>, %arg6: memref<256x128xbf16, #tpu.memory_space<vmem>>, %arg7: memref<1x128xf32, #tpu.memory_space<vmem>>, %arg8: memref<256x128xbf16, #tpu.memory_space<vmem>>, %arg9: memref<1x128xf32, #tpu.memory_space<vmem>>, %arg10: memref<256x128xbf16, #tpu.memory_space<vmem>>, %arg11: memref<1x128xf32, #tpu.memory_space<vmem>>, %arg12: memref<384x128xbf16, #tpu.memory_space<vmem>>, %arg13: memref<1x128xf32, #tpu.memory_space<vmem>>, %arg14: memref<8x128xf32, #tpu.memory_space<vmem>>) attributes {dimension_semantics = [#tpu.dimension_semantics<parallel>], iteration_bounds = array<i64: 1>, scalar_prefetch = 0 : i64, scratch_operands = 0 : i64, tpu.core_type = #tpu.core_type<tc>, window_params = [{transform_indices = @transform_0, window_bounds = array<i64: 8, 32>}, {pipeline_mode = #tpu.pipeline_mode<synchronous>, transform_indices = @transform_1, window_bounds = array<i64: 32, 256>}, {pipeline_mode = #tpu.pipeline_mode<synchronous>, transform_indices = @transform_2, window_bounds = array<i64: 1, 256>}, {pipeline_mode = #tpu.pipeline_mode<synchronous>, transform_indices = @transform_3, window_bounds = array<i64: 256, 768>}, {pipeline_mode = #tpu.pipeline_mode<synchronous>, transform_indices = @transform_4, window_bounds = array<i64: 1, 768>}, {pipeline_mode = #tpu.pipeline_mode<synchronous>, transform_indices = @transform_5, window_bounds = array<i64: 256, 128>}, {pipeline_mode = #tpu.pipeline_mode<synchronous>, transform_indices = @transform_6, window_bounds = array<i64: 1, 128>}, {pipeline_mode = #tpu.pipeline_mode<synchronous>, transform_indices = @transform_7, window_bounds = array<i64: 256, 128>}, {pipeline_mode = #tpu.pipeline_mode<synchronous>, transform_indices = @transform_8, window_bounds = array<i64: 1, 128>}, {pipeline_mode = #tpu.pipeline_mode<synchronous>, transform_indices = @transform_9, window_bounds = array<i64: 256, 128>}, {pipeline_mode = #tpu.pipeline_mode<synchronous>, transform_indices = @transform_10, window_bounds = array<i64: 1, 128>}, {pipeline_mode = #tpu.pipeline_mode<synchronous>, transform_indices = @transform_11, window_bounds = array<i64: 384, 128>}, {pipeline_mode = #tpu.pipeline_mode<synchronous>, transform_indices = @transform_12, window_bounds = array<i64: 1, 128>}, {transform_indices = @transform_13, window_bounds = array<i64: 8, 128>}]} {
    %c0 = arith.constant 0 : index
    %c0_0 = arith.constant 0 : index
    %0 = vector.load %arg1[%c0, %c0_0] : memref<8x32xf32, #tpu.memory_space<vmem>>, vector<8x32xf32>
    %1 = arith.truncf %0 : vector<8x32xf32> to vector<8x32xbf16>
    %c0_1 = arith.constant 0 : index
    %c0_2 = arith.constant 0 : index
    %2 = vector.load %arg2[%c0_1, %c0_2] : memref<32x256xbf16, #tpu.memory_space<vmem>>, vector<32x256xbf16>
    %cst = arith.constant dense<0.000000e+00> : vector<8x256xf32>
    %3 = tpu.matmul %1, %2, %cst {dimension_numbers = #tpu.dot_dimension_numbers<[1], [0], [0], [1], [0, 0, 1, 1], [], []>} : vector<8x32xbf16>, vector<32x256xbf16>, vector<8x256xf32> -> vector<8x256xf32>
    %c0_3 = arith.constant 0 : index
    %c0_4 = arith.constant 0 : index
    %4 = vector.load %arg3[%c0_3, %c0_4] : memref<1x256xf32, #tpu.memory_space<vmem>>, vector<1x256xf32>
    %5 = vector.broadcast %4 : vector<1x256xf32> to vector<8x256xf32>
    %6 = arith.addf %3, %5 : vector<8x256xf32>
    %cst_5 = arith.constant 0.000000e+00 : f32
    %7 = vector.broadcast %cst_5 : f32 to vector<8x256xf32>
    %8 = arith.cmpf ogt, %6, %7 : vector<8x256xf32>
    %cst_6 = arith.constant 0.00999999977 : f32
    %9 = vector.broadcast %cst_6 : f32 to vector<8x256xf32>
    %10 = arith.mulf %9, %6 : vector<8x256xf32>
    %11 = arith.select %8, %6, %10 : vector<8x256xi1>, vector<8x256xf32>
    %12 = arith.truncf %11 : vector<8x256xf32> to vector<8x256xbf16>
    %c0_7 = arith.constant 0 : index
    %c0_8 = arith.constant 0 : index
    %13 = vector.load %arg4[%c0_7, %c0_8] : memref<256x768xbf16, #tpu.memory_space<vmem>>, vector<256x768xbf16>
    %cst_9 = arith.constant dense<0.000000e+00> : vector<8x768xf32>
    %14 = tpu.matmul %12, %13, %cst_9 {dimension_numbers = #tpu.dot_dimension_numbers<[1], [0], [0], [1], [0, 0, 1, 1], [], []>} : vector<8x256xbf16>, vector<256x768xbf16>, vector<8x768xf32> -> vector<8x768xf32>
    %c0_10 = arith.constant 0 : index
    %c0_11 = arith.constant 0 : index
    %15 = vector.load %arg5[%c0_10, %c0_11] : memref<1x768xf32, #tpu.memory_space<vmem>>, vector<1x768xf32>
    %16 = vector.broadcast %15 : vector<1x768xf32> to vector<8x768xf32>
    %17 = arith.addf %14, %16 : vector<8x768xf32>
    %cst_12 = arith.constant 0.000000e+00 : f32
    %18 = vector.broadcast %cst_12 : f32 to vector<8x768xf32>
    %19 = arith.maximumf %17, %18 : vector<8x768xf32>
    %20 = arith.truncf %19 : vector<8x768xf32> to vector<8x768xbf16>
    %21 = vector.extract_strided_slice %20 {offsets = [0, 0], sizes = [8, 256], strides = [1, 1]} : vector<8x768xbf16> to vector<8x256xbf16>
    %22 = vector.extract_strided_slice %20 {offsets = [0, 256], sizes = [8, 256], strides = [1, 1]} : vector<8x768xbf16> to vector<8x256xbf16>
    %23 = vector.extract_strided_slice %20 {offsets = [0, 512], sizes = [8, 256], strides = [1, 1]} : vector<8x768xbf16> to vector<8x256xbf16>
    %c0_13 = arith.constant 0 : index
    %c0_14 = arith.constant 0 : index
    %24 = vector.load %arg10[%c0_13, %c0_14] : memref<256x128xbf16, #tpu.memory_space<vmem>>, vector<256x128xbf16>
    %cst_15 = arith.constant dense<0.000000e+00> : vector<8x128xf32>
    %25 = tpu.matmul %23, %24, %cst_15 {dimension_numbers = #tpu.dot_dimension_numbers<[1], [0], [0], [1], [0, 0, 1, 1], [], []>} : vector<8x256xbf16>, vector<256x128xbf16>, vector<8x128xf32> -> vector<8x128xf32>
    %c0_16 = arith.constant 0 : index
    %c0_17 = arith.constant 0 : index
    %26 = vector.load %arg11[%c0_16, %c0_17] : memref<1x128xf32, #tpu.memory_space<vmem>>, vector<1x128xf32>
    %27 = vector.broadcast %26 : vector<1x128xf32> to vector<8x128xf32>
    %28 = arith.addf %25, %27 : vector<8x128xf32>
    %c0_18 = arith.constant 0 : index
    %c0_19 = arith.constant 0 : index
    %29 = vector.load %arg6[%c0_18, %c0_19] : memref<256x128xbf16, #tpu.memory_space<vmem>>, vector<256x128xbf16>
    %cst_20 = arith.constant dense<0.000000e+00> : vector<8x128xf32>
    %30 = tpu.matmul %21, %29, %cst_20 {dimension_numbers = #tpu.dot_dimension_numbers<[1], [0], [0], [1], [0, 0, 1, 1], [], []>} : vector<8x256xbf16>, vector<256x128xbf16>, vector<8x128xf32> -> vector<8x128xf32>
    %c0_21 = arith.constant 0 : index
    %c0_22 = arith.constant 0 : index
    %31 = vector.load %arg7[%c0_21, %c0_22] : memref<1x128xf32, #tpu.memory_space<vmem>>, vector<1x128xf32>
    %32 = vector.broadcast %31 : vector<1x128xf32> to vector<8x128xf32>
    %33 = arith.addf %30, %32 : vector<8x128xf32>
    %c0_23 = arith.constant 0 : index
    %c0_24 = arith.constant 0 : index
    %34 = vector.load %arg8[%c0_23, %c0_24] : memref<256x128xbf16, #tpu.memory_space<vmem>>, vector<256x128xbf16>
    %cst_25 = arith.constant dense<0.000000e+00> : vector<8x128xf32>
    %35 = tpu.matmul %22, %34, %cst_25 {dimension_numbers = #tpu.dot_dimension_numbers<[1], [0], [0], [1], [0, 0, 1, 1], [], []>} : vector<8x256xbf16>, vector<256x128xbf16>, vector<8x128xf32> -> vector<8x128xf32>
    %c0_26 = arith.constant 0 : index
    %c0_27 = arith.constant 0 : index
    %36 = vector.load %arg9[%c0_26, %c0_27] : memref<1x128xf32, #tpu.memory_space<vmem>>, vector<1x128xf32>
    %37 = vector.broadcast %36 : vector<1x128xf32> to vector<8x128xf32>
    %38 = arith.addf %35, %37 : vector<8x128xf32>
    %cst_28 = arith.constant 0.000000e+00 : f32
    %39 = vector.broadcast %cst_28 : f32 to vector<8x128xf32>
    %40 = arith.maximumf %28, %39 : vector<8x128xf32>
    %41 = arith.truncf %40 : vector<8x128xf32> to vector<8x128xbf16>
    %cst_29 = arith.constant 0.000000e+00 : f32
    %42 = vector.broadcast %cst_29 : f32 to vector<8x128xf32>
    %43 = arith.maximumf %33, %42 : vector<8x128xf32>
    %44 = arith.truncf %43 : vector<8x128xf32> to vector<8x128xbf16>
    %cst_30 = arith.constant 0.000000e+00 : f32
    %45 = vector.broadcast %cst_30 : f32 to vector<8x128xf32>
    %46 = arith.maximumf %38, %45 : vector<8x128xf32>
    %47 = arith.truncf %46 : vector<8x128xf32> to vector<8x128xbf16>
    %48 = tpu.concatenate %41, %44, %47 in 1 : vector<8x128xbf16>, vector<8x128xbf16>, vector<8x128xbf16> -> vector<8x384xbf16>
    %c0_31 = arith.constant 0 : index
    %c0_32 = arith.constant 0 : index
    %49 = vector.load %arg12[%c0_31, %c0_32] : memref<384x128xbf16, #tpu.memory_space<vmem>>, vector<384x128xbf16>
    %cst_33 = arith.constant dense<0.000000e+00> : vector<8x128xf32>
    %50 = tpu.matmul %48, %49, %cst_33 {dimension_numbers = #tpu.dot_dimension_numbers<[1], [0], [0], [1], [0, 0, 1, 1], [], []>} : vector<8x384xbf16>, vector<384x128xbf16>, vector<8x128xf32> -> vector<8x128xf32>
    %c0_34 = arith.constant 0 : index
    %c0_35 = arith.constant 0 : index
    %51 = vector.load %arg13[%c0_34, %c0_35] : memref<1x128xf32, #tpu.memory_space<vmem>>, vector<1x128xf32>
    %52 = vector.broadcast %51 : vector<1x128xf32> to vector<8x128xf32>
    %53 = arith.addf %50, %52 : vector<8x128xf32>
    %c0_36 = arith.constant 0 : index
    %c0_37 = arith.constant 0 : index
    %54 = vector.load %arg14[%c0_36, %c0_37] : memref<8x128xf32, #tpu.memory_space<vmem>>, vector<8x128xf32>
    tpu.vector_store %arg14[%c0_36, %c0_37], %53 {strides = array<i32>} : memref<8x128xf32, #tpu.memory_space<vmem>>, vector<8x128xf32>,
    return
  }
  func.func @transform_0(%arg0: i32) -> (i32, i32) {
    %c0_i32 = arith.constant 0 : i32
    %c0_i32_0 = arith.constant 0 : i32
    return %arg0, %c0_i32 : i32, i32
  }
  func.func @transform_1(%arg0: i32) -> (i32, i32) {
    %c0_i32 = arith.constant 0 : i32
    %c0_i32_0 = arith.constant 0 : i32
    %c0_i32_1 = arith.constant 0 : i32
    return %c0_i32, %c0_i32_0 : i32, i32
  }
  func.func @transform_2(%arg0: i32) -> (i32, i32) {
    %c0_i32 = arith.constant 0 : i32
    %c0_i32_0 = arith.constant 0 : i32
    %c0_i32_1 = arith.constant 0 : i32
    return %c0_i32, %c0_i32_0 : i32, i32
  }
  func.func @transform_3(%arg0: i32) -> (i32, i32) {
    %c0_i32 = arith.constant 0 : i32
    %c0_i32_0 = arith.constant 0 : i32
    %c0_i32_1 = arith.constant 0 : i32
    return %c0_i32, %c0_i32_0 : i32, i32
  }
  func.func @transform_4(%arg0: i32) -> (i32, i32) {
    %c0_i32 = arith.constant 0 : i32
    %c0_i32_0 = arith.constant 0 : i32
    %c0_i32_1 = arith.constant 0 : i32
    return %c0_i32, %c0_i32_0 : i32, i32
  }
  func.func @transform_5(%arg0: i32) -> (i32, i32) {
    %c0_i32 = arith.constant 0 : i32
    %c0_i32_0 = arith.constant 0 : i32
    %c0_i32_1 = arith.constant 0 : i32
    return %c0_i32, %c0_i32_0 : i32, i32
  }
  func.func @transform_6(%arg0: i32) -> (i32, i32) {
    %c0_i32 = arith.constant 0 : i32
    %c0_i32_0 = arith.constant 0 : i32
    %c0_i32_1 = arith.constant 0 : i32
    return %c0_i32, %c0_i32_0 : i32, i32
  }
  func.func @transform_7(%arg0: i32) -> (i32, i32) {
    %c0_i32 = arith.constant 0 : i32
    %c0_i32_0 = arith.constant 0 : i32
    %c0_i32_1 = arith.constant 0 : i32
    return %c0_i32, %c0_i32_0 : i32, i32
  }
  func.func @transform_8(%arg0: i32) -> (i32, i32) {
    %c0_i32 = arith.constant 0 : i32
    %c0_i32_0 = arith.constant 0 : i32
    %c0_i32_1 = arith.constant 0 : i32
    return %c0_i32, %c0_i32_0 : i32, i32
  }
  func.func @transform_9(%arg0: i32) -> (i32, i32) {
    %c0_i32 = arith.constant 0 : i32
    %c0_i32_0 = arith.constant 0 : i32
    %c0_i32_1 = arith.constant 0 : i32
    return %c0_i32, %c0_i32_0 : i32, i32
  }
  func.func @transform_10(%arg0: i32) -> (i32, i32) {
    %c0_i32 = arith.constant 0 : i32
    %c0_i32_0 = arith.constant 0 : i32
    %c0_i32_1 = arith.constant 0 : i32
    return %c0_i32, %c0_i32_0 : i32, i32
  }
  func.func @transform_11(%arg0: i32) -> (i32, i32) {
    %c0_i32 = arith.constant 0 : i32
    %c0_i32_0 = arith.constant 0 : i32
    %c0_i32_1 = arith.constant 0 : i32
    return %c0_i32, %c0_i32_0 : i32, i32
  }
  func.func @transform_12(%arg0: i32) -> (i32, i32) {
    %c0_i32 = arith.constant 0 : i32
    %c0_i32_0 = arith.constant 0 : i32
    %c0_i32_1 = arith.constant 0 : i32
    return %c0_i32, %c0_i32_0 : i32, i32
  }
  func.func @transform_13(%arg0: i32) -> (i32, i32) {
    %c0_i32 = arith.constant 0 : i32
    %c0_i32_0 = arith.constant 0 : i32
    return %arg0, %c0_i32 : i32, i32
  }
}

</mosaic_0001>

<bundles_post_ra>
// kernel: tpu_custom_call.1
= control target key start
LH: loop header
LB: loop body
LE: loop exit
PB: predicated region body
PF: predicated region fallthrough
CT: control target
= control target key end

     0   :  { %18 = vsyncpa [#allocation3], 0  ;;  %s2775_s0 = inlined_call_operand.hbm [shape: f32[8,32], index: 0, kind: input, shape index: {}]   ;;  %s2776_s1 = inlined_call_operand.hbm [shape: bf16[32,256], index: 1, kind: input, shape index: {}]   ;;  %s2777_s2 = inlined_call_operand.vmem [shape: f32[1,256], index: 2, kind: input, shape index: {}]   ;;  %s2778_s3 = inlined_call_operand.hbm [shape: bf16[256,768], index: 3, kind: input, shape index: {}]   ;;  %s2779_s4 = inlined_call_operand.vmem [shape: f32[1,768], index: 4, kind: input, shape index: {}]   ;;  %s2780_s5 = inlined_call_operand.hbm [shape: bf16[256,128], index: 5, kind: input, shape index: {}]   ;;  %s2781_s6 = inlined_call_operand.vmem [shape: f32[1,128], index: 6, kind: input, shape index: {}]   ;;  %s2782_s7 = inlined_call_operand.hbm [shape: bf16[256,128], index: 7, kind: input, shape index: {}]   ;;  %s2783_s8 = inlined_call_operand.vmem [shape: f32[1,128], index: 8, kind: input, shape index: {}]   ;;  %s2784_s9 = inlined_call_operand.hbm [shape: bf16[256,128], index: 9, kind: input, shape index: {}]   ;;  %s2785_s10 = inlined_call_operand.vmem [shape: f32[1,128], index: 10, kind: input, shape index: {}]   ;;  %s2786_s11 = inlined_call_operand.hbm [shape: bf16[384,128], index: 11, kind: input, shape index: {}]   ;;  %s2787_s12 = inlined_call_operand.vmem [shape: f32[1,128], index: 12, kind: input, shape index: {}]   ;;  %s2788_s13 = inlined_call_operand.hbm [shape: f32[8,128], index: 13, kind: output, shape index: {}]  }
   0x1   :  { %19 = vsyncpa [#allocation6], 0 }
   0x2   :  { %20 = vsyncpa [#allocation9], 0 }
   0x3   :  { %21 = vsyncpa [#allocation12], 0 }
   0x4   :  { %22 = vsyncpa [#allocation4], 0  ;;  %s2521_s25 = smov [#allocation5]   ;;  %s2335_s29 = scalar_lea.hbm %s2776_s1, 512 }
   0x5   :  { %s38_s26 = sshll.u32 %s2521_s25, 4  ;;  %p2336_p0 = scmp.ne.s32.totalorder %s2776_s1, %s2335_s29  ;;  %s39_s26 = int_to_ptr.vmem [resolvable:$true] %s38_s26 }
   0x6   :  { %p2339_p1 = scmp.lt.u32.totalorder %s2335_s29, %s2776_s1 }
   0x8   :  { %p2341_p2 = pnand %p2339_p1, %p2336_p0 }
   0xa   :  { %2344 = shalt.err (!%p2341_p2)
}
   0xb   :  { %s2345_s17 = scalar_lea.vmem %s39_s26, 512  ;;  %p2350_p4 = scmp.lt.s32.totalorder %s39_s26, %s39_s26 }
   0xc   :  { %p2346_p3 = scmp.ne.s32.totalorder %s39_s26, %s2345_s17  ;;  %p2351_p5 = scmp.lt.s32.totalorder %s2345_s17, %s2345_s17 }
   0xe   :  { %p2352_p6 = por %p2351_p5, %p2350_p4 }
  0x10   :  { %p2353_p7 = pnand %p2352_p6, %p2346_p3 }
  0x12   :  { %2356 = shalt.err (!%p2353_p7)
}
  0x13   :  { %s2522_s18 = smov 128   ;;  %s2523_s19 = smov 8  }
  0x14   :  { %44 = dma.hbm_to_vmem [thread:$0]  %s2776_s1, 512, %s39_s26, [#allocation6], %s2522_s18, %s2522_s18, %s2523_s19  }
  0x15   :  { %s2524_s22 = smov [#allocation8]   ;;  %s2357_s27 = scalar_lea.hbm %s2780_s5, 2048 }
  0x16   :  { %s66_s23 = sshll.u32 %s2524_s22, 4  ;;  %p2358_p8 = scmp.ne.s32.totalorder %s2780_s5, %s2357_s27  ;;  %s67_s23 = int_to_ptr.vmem [resolvable:$true] %s66_s23 }
  0x17   :  { %p2361_p9 = scmp.lt.u32.totalorder %s2357_s27, %s2780_s5 }
  0x19   :  { %p2363_p10 = pnand %p2361_p9, %p2358_p8 }
  0x1b   :  { %2366 = shalt.err (!%p2363_p10)
}
  0x1c   :  { %s2367_s15 = scalar_lea.vmem %s67_s23, 2048  ;;  %p2372_p12 = scmp.lt.s32.totalorder %s67_s23, %s67_s23 }
  0x1d   :  { %p2368_p11 = scmp.ne.s32.totalorder %s67_s23, %s2367_s15  ;;  %p2373_p13 = scmp.lt.s32.totalorder %s2367_s15, %s2367_s15 }
  0x1f   :  { %p2374_p0 = por %p2373_p13, %p2372_p12 }
  0x21   :  { %p2375_p1 = pnand %p2374_p0, %p2368_p11 }
  0x23   :  { %2378 = shalt.err (!%p2375_p1)
}
  0x24   :  { %s2525_s1 = smov 64   ;;  %s2526_s26 = smov 4  }
  0x25   :  { %72 = dma.hbm_to_vmem [thread:$0]  %s2780_s5, 2048, %s67_s23, [#allocation9], %s2525_s1, %s2525_s1, %s2526_s26  }
  0x26   :  { %s2527_s18 = smov [#allocation11]   ;;  %s2528_s20 = smov [#allocation2]  }
  0x27   :  { %s94_s19 = sshll.u32 %s2527_s18, 4  ;;  %s29_s21 = sshll.u32 %s2528_s20, 4  ;;  %s95_s19 = int_to_ptr.vmem [resolvable:$true] %s94_s19  ;;  %s30_s21 = int_to_ptr.vmem [resolvable:$true] %s29_s21 }
  0x28   :  { %s2379_s25 = scalar_lea.hbm %s2784_s9, 2048 }
  0x29   :  { %p2380_p2 = scmp.ne.s32.totalorder %s2784_s9, %s2379_s25  ;;  %p2383_p3 = scmp.lt.u32.totalorder %s2379_s25, %s2784_s9 }
  0x2b   :  { %p2385_p4 = pnand %p2383_p3, %p2380_p2 }
  0x2d   :  { %2388 = shalt.err (!%p2385_p4)
}
  0x2e   :  { %s2389_s5 = scalar_lea.vmem %s95_s19, 2048  ;;  %p2394_p6 = scmp.lt.s32.totalorder %s95_s19, %s95_s19 }
  0x2f   :  { %p2390_p5 = scmp.ne.s32.totalorder %s95_s19, %s2389_s5  ;;  %p2395_p7 = scmp.lt.s32.totalorder %s2389_s5, %s2389_s5 }
  0x31   :  { %p2396_p8 = por %p2395_p7, %p2394_p6 }
  0x33   :  { %p2397_p9 = pnand %p2396_p8, %p2390_p5 }
  0x35   :  { %2400 = shalt.err (!%p2397_p9)
}
  0x36   :  { %100 = dma.hbm_to_vmem [thread:$0]  %s2784_s9, 2048, %s95_s19, [#allocation12], %s2525_s1, %s2525_s1, %s2526_s26  }
  0x37   :  { %s2401_s17 = scalar_lea.hbm %s2775_s0, 128 }
  0x38   :  { %p2402_p10 = scmp.ne.s32.totalorder %s2775_s0, %s2401_s17  ;;  %p2405_p11 = scmp.lt.u32.totalorder %s2401_s17, %s2775_s0 }
  0x3a   :  { %p2407_p12 = pnand %p2405_p11, %p2402_p10 }
  0x3c   :  { %2410 = shalt.err (!%p2407_p12)
}
  0x3d   :  { %s2411_s25 = scalar_lea.vmem %s30_s21, 128  ;;  %p2416_p0 = scmp.lt.s32.totalorder %s30_s21, %s30_s21 }
  0x3e   :  { %p2412_p13 = scmp.ne.s32.totalorder %s30_s21, %s2411_s25  ;;  %p2417_p1 = scmp.lt.s32.totalorder %s2411_s25, %s2411_s25 }
  0x40   :  { %p2418_p2 = por %p2417_p1, %p2416_p0 }
  0x42   :  { %p2419_p3 = pnand %p2418_p2, %p2412_p13 }
  0x44   :  { %2422 = shalt.err (!%p2419_p3)
}
  0x45   :  { %32 = dma.hbm_to_vmem [thread:$0]  %s2775_s0, 128, %s30_s21, [#allocation3]  }
  0x46   :  { %s2529_s27 = smov [#allocation7]   ;;  %s2423_s5 = scalar_lea.hbm %s2778_s3, 12288 }
  0x47   :  { %s52_s28 = sshll.u32 %s2529_s27, 4  ;;  %p2424_p4 = scmp.ne.s32.totalorder %s2778_s3, %s2423_s5  ;;  %s53_s28 = int_to_ptr.vmem [resolvable:$true] %s52_s28 }
  0x48   :  { %p2427_p5 = scmp.lt.u32.totalorder %s2423_s5, %s2778_s3 }
  0x4a   :  { %p2429_p6 = pnand %p2427_p5, %p2424_p4 }
  0x4c   :  { %2432 = shalt.err (!%p2429_p6)
}
  0x4d   :  { %s2433_s17 = scalar_lea.vmem %s53_s28, 12288  ;;  %p2438_p8 = scmp.lt.s32.totalorder %s53_s28, %s53_s28 }
  0x4e   :  { %p2434_p7 = scmp.ne.s32.totalorder %s53_s28, %s2433_s17  ;;  %p2439_p9 = scmp.lt.s32.totalorder %s2433_s17, %s2433_s17 }
  0x50   :  { %p2440_p10 = por %p2439_p9, %p2438_p8 }
  0x52   :  { %p2441_p11 = pnand %p2440_p10, %p2434_p7 }
  0x54   :  { %2444 = shalt.err (!%p2441_p11)
}
  0x55   :  { %s2530_s0 = smov 384   ;;  %s2531_s21 = smov 24  }
  0x56   :  { %58 = dma.hbm_to_vmem [thread:$0]  %s2778_s3, 12288, %s53_s28, [#allocation6], %s2530_s0, %s2530_s0, %s2531_s21  }
  0x57   :  { %s2532_s22 = smov [#allocation10]   ;;  %s2533_s25 = smov [#allocation13]  }
  0x58   :  { %s80_s24 = sshll.u32 %s2532_s22, 4  ;;  %s108_s9 = sshll.u32 %s2533_s25, 4  ;;  %s81_s24 = int_to_ptr.vmem [resolvable:$true] %s80_s24  ;;  %s109_s9 = int_to_ptr.vmem [resolvable:$true] %s108_s9 }
  0x59   :  { %s2445_s29 = scalar_lea.hbm %s2782_s7, 2048 }
  0x5a   :  { %p2446_p12 = scmp.ne.s32.totalorder %s2782_s7, %s2445_s29  ;;  %p2449_p13 = scmp.lt.u32.totalorder %s2445_s29, %s2782_s7 }
  0x5c   :  { %p2451_p0 = pnand %p2449_p13, %p2446_p12 }
  0x5e   :  { %2454 = shalt.err (!%p2451_p0)
}
  0x5f   :  { %s2455_s3 = scalar_lea.vmem %s81_s24, 2048  ;;  %p2460_p2 = scmp.lt.s32.totalorder %s81_s24, %s81_s24 }
  0x60   :  { %p2456_p1 = scmp.ne.s32.totalorder %s81_s24, %s2455_s3  ;;  %p2461_p3 = scmp.lt.s32.totalorder %s2455_s3, %s2455_s3 }
  0x62   :  { %p2462_p4 = por %p2461_p3, %p2460_p2 }
  0x64   :  { %p2463_p5 = pnand %p2462_p4, %p2456_p1 }
  0x66   :  { %2466 = shalt.err (!%p2463_p5)
}
  0x67   :  { %86 = dma.hbm_to_vmem [thread:$0]  %s2782_s7, 2048, %s81_s24, [#allocation9], %s2525_s1, %s2525_s1, %s2526_s26  }
  0x68   :  { %s2467_s0 = scalar_lea.hbm %s2786_s11, 3072 }
  0x69   :  { %p2468_p6 = scmp.ne.s32.totalorder %s2786_s11, %s2467_s0  ;;  %p2471_p7 = scmp.lt.u32.totalorder %s2467_s0, %s2786_s11 }
  0x6b   :  { %p2473_p8 = pnand %p2471_p7, %p2468_p6 }
  0x6d   :  { %2476 = shalt.err (!%p2473_p8)
}
  0x6e   :  { %s2477_s25 = scalar_lea.vmem %s109_s9, 3072  ;;  %p2482_p10 = scmp.lt.s32.totalorder %s109_s9, %s109_s9 }
  0x6f   :  { %p2478_p9 = scmp.ne.s32.totalorder %s109_s9, %s2477_s25  ;;  %p2483_p11 = scmp.lt.s32.totalorder %s2477_s25, %s2477_s25 }
  0x71   :  { %p2484_p12 = por %p2483_p11, %p2482_p10 }
  0x73   :  { %p2485_p13 = pnand %p2484_p12, %p2478_p9 }
  0x75   :  { %2488 = shalt.err (!%p2485_p13)
}
  0x76   :  { %114 = dma.hbm_to_vmem [thread:$0]  %s2786_s11, 3072, %s109_s9, [#allocation12], %s2525_s1, %s2525_s1, %s2526_s26  }
  0x77   :  { %2511 = dma.done.wait [#allocation3], 128  }
  0x78   :  { %2512 = vsyncadd [#allocation3], 4294967168 }
  0x79   :  { %2513 = dma.done.wait [#allocation6], 12800  }
  0x7a   :  { %2514 = vsyncadd [#allocation6], 4294954496 }
  0x7b   :  { %2515 = dma.done.wait [#allocation9], 4096  }
  0x7c   :  { %2516 = vsyncadd [#allocation9], 4294963200 }
  0x7d   :  { %2517 = dma.done.wait [#allocation12], 5120  }
  0x7e   :  { %2518 = vsyncadd [#allocation12], 4294962176  ;;  %v2534_v0 = vmov 0   ;;  %v2113_v1 = vld [vmem:[#allocation5 + $0x4] ss:$8 sps:$4 sm:$0xff]   ;;  %v139_v5 = vld [vmem:[#allocation2] sm:$0xff] }
  0x7f   :  { %213 = vmatprep.mubr.bf16.mxu0 %v2534_v0  ;;  %v2115_v2 = vld [vmem:[#allocation5] ss:$8 sps:$4 sm:$0xff]   ;;  %181 = vmatprep.subr.bf16.mxu0 %v2113_v1  ;;  %v2116_v3 = vld [vmem:[#allocation5 + $0x14] ss:$8 sps:$4 sm:$0xff]   ;;  %v2118_v4 = vld [vmem:[#allocation5 + $0x10] ss:$8 sps:$4 sm:$0xff]   ;;  %v140_v9 = vpack.c.bf16 %v139_v5, %v139_v5 }
  0x80   :  { %182 = vmatpush1.bf16.msra.mxu0 %v2115_v2  ;;  %v2119_v6 = vld [vmem:[#allocation7 + $0x4] ss:$24 sps:$4 sm:$0xff]   ;;  %v2121_v7 = vld [vmem:[#allocation7] ss:$24 sps:$4 sm:$0xff]   ;;  %v2125_v10 = vld [vmem:[#allocation7 + $0x34] ss:$24 sps:$4 sm:$0xff]  }
  0x81   :  { %183 = vmatprep.subr.bf16.mxu0 %v2116_v3  ;;  %838 = vmatprep.subr.bf16.mxu1 %v2119_v6  ;;  %v2124_v8 = vld [vmem:[#allocation7 + $0xc] ss:$24 sps:$4 sm:$0xff]   ;;  %v2127_v11 = vld [vmem:[#allocation7 + $0x30] ss:$24 sps:$4 sm:$0xff]   ;;  %vm177_vm0 = vcmask 261120   ;;  %vm2536_vm3 = vmmov 0  }
  0x82   :  { %839 = vmatpush1.bf16.msra.mxu1 %v2121_v7  ;;  %v2122_v12 = vld [vmem:[#allocation7 + $0x8] ss:$24 sps:$4 sm:$0xff]   ;;  %v2130_v13 = vld [vmem:[#allocation7 + $0x3c] ss:$24 sps:$4 sm:$0xff]   ;;  %v2128_v15 = vld [vmem:[#allocation7 + $0x38] ss:$24 sps:$4 sm:$0xff]  }
  0x83   :  { %840 = vmatprep.subr.bf16.mxu1 %v2125_v10  ;;  %v2131_v14 = vld [vmem:[#allocation7 + $0x64] ss:$24 sps:$4 sm:$0xff]   ;;  %v2133_v16 = vld [vmem:[#allocation7 + $0x60] ss:$24 sps:$4 sm:$0xff]   ;;  %v2137_v17 = vld [vmem:[#allocation7 + $0x94] ss:$24 sps:$4 sm:$0xff]  }
  0x84   :  { %184 = vmatpush1.bf16.msra.mxu0 %v2118_v4  ;;  %v2136_v18 = vld [vmem:[#allocation7 + $0x6c] ss:$24 sps:$4 sm:$0xff]   ;;  %v2134_v19 = vld [vmem:[#allocation7 + $0x68] ss:$24 sps:$4 sm:$0xff]   ;;  %v2142_v22 = vld [vmem:[#allocation7 + $0x9c] ss:$24 sps:$4 sm:$0xff]  }
  0x85   :  { %879 = vmatprep.subr.bf16.mxu0 %v2124_v8  ;;  %v2139_v20 = vld [vmem:[#allocation7 + $0x90] ss:$24 sps:$4 sm:$0xff]   ;;  %v2143_v21 = vld [vmem:[#allocation7 + $0xc4] ss:$24 sps:$4 sm:$0xff]   ;;  %v2145_v24 = vld [vmem:[#allocation7 + $0xc0] ss:$24 sps:$4 sm:$0xff]   ;;  %v147_v8 = vlaneseq }
  0x86   :  { %841 = vmatpush1.bf16.msra.mxu1 %v2127_v11  ;;  %v2140_v23 = vld [vmem:[#allocation7 + $0x98] ss:$24 sps:$4 sm:$0xff]   ;;  %v2149_v25 = vld [vmem:[#allocation7 + $0xf4] ss:$24 sps:$4 sm:$0xff]   ;;  %v2146_v27 = vld [vmem:[#allocation7 + $0xc8] ss:$24 sps:$4 sm:$0xff]  }
  0x87   :  { %1806 = vmatmul.mubr.msk.bf16.vlgmr.msra.gmra.mrb[0].mxu0 %vm177_vm0, %v140_v9  ;;  %842 = vmatprep.subr.bf16.mxu1 %v2131_v14  ;;  %v2148_v26 = vld [vmem:[#allocation7 + $0xcc] ss:$24 sps:$4 sm:$0xff]   ;;  %v2151_v28 = vld [vmem:[#allocation7 + $0xf0] ss:$24 sps:$4 sm:$0xff]   ;;  %v2154_v30 = vld [vmem:[#allocation7 + $0xfc] ss:$24 sps:$4 sm:$0xff]  }
  0x88   :  { %880 = vmatpush1.bf16.msra.mxu0 %v2122_v12  ;;  %v2155_v29 = vld [vmem:[#allocation7 + $0x124] ss:$24 sps:$4 sm:$0xff]   ;;  %v2152_v31 = vld [vmem:[#allocation7 + $0xf8] ss:$24 sps:$4 sm:$0xff]   ;;  %v2161_v33 = vld [vmem:[#allocation7 + $0x154] ss:$24 sps:$4 sm:$0xff]  }
  0x89   :  { %881 = vmatprep.subr.bf16.mxu0 %v2130_v13  ;;  %v2157_v32 = vld [vmem:[#allocation7 + $0x120] ss:$24 sps:$4 sm:$0xff]   ;;  %v2160_v34 = vld [vmem:[#allocation7 + $0x12c] ss:$24 sps:$4 sm:$0xff]   ;;  %v2163_v36 = vld [vmem:[#allocation7 + $0x150] ss:$24 sps:$4 sm:$0xff]  }
  0x8a   :  { %843 = vmatpush1.bf16.msra.mxu1 %v2133_v16  ;;  %v2158_v35 = vld [vmem:[#allocation7 + $0x128] ss:$24 sps:$4 sm:$0xff]   ;;  %v2167_v37 = vld [vmem:[#allocation7 + $0x184] ss:$24 sps:$4 sm:$0xff]   ;;  %v2164_v39 = vld [vmem:[#allocation7 + $0x158] ss:$24 sps:$4 sm:$0xff]  }
  0x8b   :  { %844 = vmatprep.subr.bf16.mxu1 %v2137_v17  ;;  %v2166_v38 = vld [vmem:[#allocation7 + $0x15c] ss:$24 sps:$4 sm:$0xff]   ;;  %v2169_v40 = vld [vmem:[#allocation7 + $0x180] ss:$24 sps:$4 sm:$0xff]   ;;  %v2172_v42 = vld [vmem:[#allocation7 + $0x18c] ss:$24 sps:$4 sm:$0xff]  }
  0x8c   :  { %882 = vmatpush1.bf16.msra.mxu0 %v2128_v15  ;;  %v2173_v41 = vld [vmem:[#allocation7 + $0x1b4] ss:$24 sps:$4 sm:$0xff]   ;;  %v2170_v43 = vld [vmem:[#allocation7 + $0x188] ss:$24 sps:$4 sm:$0xff]   ;;  %v2179_v45 = vld [vmem:[#allocation7 + $0x1e4] ss:$24 sps:$4 sm:$0xff]  }
  0x8d   :  { %883 = vmatprep.subr.bf16.mxu0 %v2136_v18  ;;  %v2175_v44 = vld [vmem:[#allocation7 + $0x1b0] ss:$24 sps:$4 sm:$0xff]   ;;  %v2178_v46 = vld [vmem:[#allocation7 + $0x1bc] ss:$24 sps:$4 sm:$0xff]   ;;  %v2181_v47 = vld [vmem:[#allocation7 + $0x1e0] ss:$24 sps:$4 sm:$0xff]  }
  0x8e   :  { %845 = vmatpush1.bf16.msra.mxu1 %v2139_v20  ;;  %v2176_v48 = vld [vmem:[#allocation7 + $0x1b8] ss:$24 sps:$4 sm:$0xff]   ;;  %v2185_v49 = vld [vmem:[#allocation7 + $0x214] ss:$24 sps:$4 sm:$0xff]   ;;  %v2182_v52 = vld [vmem:[#allocation7 + $0x1e8] ss:$24 sps:$4 sm:$0xff]  }
  0x8f   :  { %846 = vmatprep.subr.bf16.mxu1 %v2143_v21  ;;  %v2184_v50 = vld [vmem:[#allocation7 + $0x1ec] ss:$24 sps:$4 sm:$0xff]   ;;  %v2187_v51 = vld [vmem:[#allocation7 + $0x210] ss:$24 sps:$4 sm:$0xff]   ;;  %v2190_v54 = vld [vmem:[#allocation7 + $0x21c] ss:$24 sps:$4 sm:$0xff]  }
  0x90   :  { %884 = vmatpush1.bf16.msra.mxu0 %v2134_v19  ;;  %v2191_v53 = vld [vmem:[#allocation7 + $0x244] ss:$24 sps:$4 sm:$0xff]   ;;  %v2193_v55 = vld [vmem:[#allocation7 + $0x240] ss:$24 sps:$4 sm:$0xff]   ;;  %v2197_v57 = vld [vmem:[#allocation7 + $0x274] ss:$24 sps:$4 sm:$0xff]  }
  0x91   :  { %885 = vmatprep.subr.bf16.mxu0 %v2142_v22  ;;  %v2188_v56 = vld [vmem:[#allocation7 + $0x218] ss:$24 sps:$4 sm:$0xff]   ;;  %v2196_v58 = vld [vmem:[#allocation7 + $0x24c] ss:$24 sps:$4 sm:$0xff]   ;;  %v2194_v60 = vld [vmem:[#allocation7 + $0x248] ss:$24 sps:$4 sm:$0xff]  }
  0x92   :  { %847 = vmatpush1.bf16.msra.mxu1 %v2145_v24  ;;  %v2199_v59 = vld [vmem:[#allocation7 + $0x270] ss:$24 sps:$4 sm:$0xff]   ;;  %v2202_v61 = vld [vmem:[#allocation7 + $0x27c] ss:$24 sps:$4 sm:$0xff]   ;;  %v2205_v0 = vld [vmem:[#allocation7 + $0x2a0] ss:$24 sps:$4 sm:$0xff]  }
  0x93   :  { %848 = vmatprep.subr.bf16.mxu1 %v2149_v25  ;;  %v2200_v62 = vld [vmem:[#allocation7 + $0x278] ss:$24 sps:$4 sm:$0xff]   ;;  %v2203_v63 = vld [vmem:[#allocation7 + $0x2a4] ss:$24 sps:$4 sm:$0xff]   ;;  %v2206_v2 = vld [vmem:[#allocation7 + $0x2a8] ss:$24 sps:$4 sm:$0xff]  }
  0x94   :  { %886 = vmatpush1.bf16.msra.mxu0 %v2140_v23  ;;  %v2208_v1 = vld [vmem:[#allocation7 + $0x2ac] ss:$24 sps:$4 sm:$0xff]   ;;  %v2211_v4 = vld [vmem:[#allocation7 + $0x2d0] ss:$24 sps:$4 sm:$0xff]   ;;  %v2214_v6 = vld [vmem:[#allocation7 + $0x2dc] ss:$24 sps:$4 sm:$0xff]  }
  0x95   :  { %887 = vmatprep.subr.bf16.mxu0 %v2148_v26  ;;  %v2209_v3 = vld [vmem:[#allocation7 + $0x2d4] ss:$24 sps:$4 sm:$0xff]   ;;  %v2212_v5 = vld [vmem:[#allocation7 + $0x2d8] ss:$24 sps:$4 sm:$0xff]   ;;  %v2704_v9 = vshrl.u32 %v147_v8, 7 }
  0x96   :  { %849 = vmatpush1.bf16.msra.mxu1 %v2151_v28  ;;  %v2217_v7 = vld [vmem:[#allocation7 + $0x14] ss:$24 sps:$4 sm:$0xff]   ;;  %v145_v11 = vld [vmem:[%s2777_s2] sm:$0x3]  ;;  %v2215_v26 = vld [vmem:[#allocation7 + $0x10] ss:$24 sps:$4 sm:$0xff]  }
  0x97   :  { %850 = vmatprep.subr.bf16.mxu1 %v2155_v29  ;;  %v149_v10 = vsub.s32 0, %v2704_v9  ;;  %v153_v12 = vsub.s32 1, %v2704_v9  ;;  %v2220_v28 = vld [vmem:[#allocation7 + $0x44] ss:$24 sps:$4 sm:$0xff]   ;;  %v2218_v29 = vld [vmem:[#allocation7 + $0x40] ss:$24 sps:$4 sm:$0xff]  }
  0x98   :  { %888 = vmatpush1.bf16.msra.mxu0 %v2146_v27  ;;  %v2277_v8 = vld [vmem:[#allocation10 + $0x78] sm:$0xff]  }
  0x99   :  { %889 = vmatprep.subr.bf16.mxu0 %v2154_v30  ;;  %v150_v13 = vrot.slane %v145_v11, %v149_v10  ;;  %v154_v14 = vrot.slane %v145_v11, %v153_v12  ;;  %v2223_v30 = vld [vmem:[#allocation7 + $0x74] ss:$24 sps:$4 sm:$0xff]   ;;  %v2278_v11 = vld [vmem:[#allocation10 + $0x38] sm:$0xff]  }
  0x9a   :  { %851 = vmatpush1.bf16.msra.mxu1 %v2157_v32  ;;  %v2226_v32 = vld [vmem:[#allocation7 + $0xa4] ss:$24 sps:$4 sm:$0xff]  }
  0x9b   :  { %852 = vmatprep.subr.bf16.mxu1 %v2161_v33  ;;  %v2224_v33 = vld [vmem:[#allocation7 + $0xa0] ss:$24 sps:$4 sm:$0xff]  }
  0x9c   :  { %890 = vmatpush1.bf16.msra.mxu0 %v2152_v31  ;;  %v2221_v31 = vld [vmem:[#allocation7 + $0x70] ss:$24 sps:$4 sm:$0xff]  }
  0x9d   :  { %891 = vmatprep.subr.bf16.mxu0 %v2160_v34  ;;  %v2229_v34 = vld [vmem:[#allocation7 + $0xd4] ss:$24 sps:$4 sm:$0xff]  }
  0x9e   :  { %853 = vmatpush1.bf16.msra.mxu1 %v2163_v36  ;;  %v2232_v36 = vld [vmem:[#allocation7 + $0x104] ss:$24 sps:$4 sm:$0xff]  }
  0x9f   :  { %854 = vmatprep.subr.bf16.mxu1 %v2167_v37  ;;  %v2230_v37 = vld [vmem:[#allocation7 + $0x100] ss:$24 sps:$4 sm:$0xff]  }
  0xa0   :  { %892 = vmatpush1.bf16.msra.mxu0 %v2158_v35  ;;  %v2227_v35 = vld [vmem:[#allocation7 + $0xd0] ss:$24 sps:$4 sm:$0xff]  }
  0xa1   :  { %893 = vmatprep.subr.bf16.mxu0 %v2166_v38  ;;  %v2235_v38 = vld [vmem:[#allocation7 + $0x134] ss:$24 sps:$4 sm:$0xff]  }
  0xa2   :  { %855 = vmatpush1.bf16.msra.mxu1 %v2169_v40  ;;  %v2238_v40 = vld [vmem:[#allocation7 + $0x164] ss:$24 sps:$4 sm:$0xff]  }
  0xa3   :  { %856 = vmatprep.subr.bf16.mxu1 %v2173_v41  ;;  %v2236_v41 = vld [vmem:[#allocation7 + $0x160] ss:$24 sps:$4 sm:$0xff]  }
  0xa4   :  { %894 = vmatpush1.bf16.msra.mxu0 %v2164_v39  ;;  %v2233_v39 = vld [vmem:[#allocation7 + $0x130] ss:$24 sps:$4 sm:$0xff]  }
  0xa5   :  { %895 = vmatprep.subr.bf16.mxu0 %v2172_v42  ;;  %v2241_v42 = vld [vmem:[#allocation7 + $0x194] ss:$24 sps:$4 sm:$0xff]  }
  0xa6   :  { %857 = vmatpush1.bf16.msra.mxu1 %v2175_v44  ;;  %v2244_v44 = vld [vmem:[#allocation7 + $0x1c4] ss:$24 sps:$4 sm:$0xff]  }
  0xa7   :  { %858 = vmatprep.subr.bf16.mxu1 %v2179_v45  ;;  %v2242_v45 = vld [vmem:[#allocation7 + $0x1c0] ss:$24 sps:$4 sm:$0xff]  }
  0xa8   :  { %896 = vmatpush1.bf16.msra.mxu0 %v2170_v43  ;;  %v2239_v43 = vld [vmem:[#allocation7 + $0x190] ss:$24 sps:$4 sm:$0xff]  }
  0xa9   :  { %897 = vmatprep.subr.bf16.mxu0 %v2178_v46  ;;  %v2247_v46 = vld [vmem:[#allocation7 + $0x1f4] ss:$24 sps:$4 sm:$0xff]  }
  0xaa   :  { %859 = vmatpush1.bf16.msra.mxu1 %v2181_v47  ;;  %v2245_v47 = vld [vmem:[#allocation7 + $0x1f0] ss:$24 sps:$4 sm:$0xff]  }
  0xab   :  { %860 = vmatprep.subr.bf16.mxu1 %v2185_v49  ;;  %v2248_v49 = vld [vmem:[#allocation7 + $0x220] ss:$24 sps:$4 sm:$0xff]  }
  0xac   :  { %898 = vmatpush1.bf16.msra.mxu0 %v2176_v48  ;;  %v2250_v48 = vld [vmem:[#allocation7 + $0x224] ss:$24 sps:$4 sm:$0xff]  }
  0xad   :  { %899 = vmatprep.subr.bf16.mxu0 %v2184_v50  ;;  %v2253_v50 = vld [vmem:[#allocation7 + $0x254] ss:$24 sps:$4 sm:$0xff]  }
  0xae   :  { %861 = vmatpush1.bf16.msra.mxu1 %v2187_v51  ;;  %v2251_v51 = vld [vmem:[#allocation7 + $0x250] ss:$24 sps:$4 sm:$0xff]  }
  0xaf   :  { %862 = vmatprep.subr.bf16.mxu1 %v2191_v53  ;;  %v2254_v53 = vld [vmem:[#allocation7 + $0x280] ss:$24 sps:$4 sm:$0xff]  }
  0xb0   :  { %900 = vmatpush1.bf16.msra.mxu0 %v2182_v52  ;;  %v2256_v52 = vld [vmem:[#allocation7 + $0x284] ss:$24 sps:$4 sm:$0xff]  }
  0xb1   :  { %901 = vmatprep.subr.bf16.mxu0 %v2190_v54  ;;  %v2259_v54 = vld [vmem:[#allocation7 + $0x2b4] ss:$24 sps:$4 sm:$0xff]  }
  0xb2   :  { %863 = vmatpush1.bf16.msra.mxu1 %v2193_v55  ;;  %v2257_v55 = vld [vmem:[#allocation7 + $0x2b0] ss:$24 sps:$4 sm:$0xff]  }
  0xb3   :  { %864 = vmatprep.subr.bf16.mxu1 %v2197_v57  ;;  %v2260_v57 = vld [vmem:[#allocation7 + $0x2e0] ss:$24 sps:$4 sm:$0xff]  }
  0xb4   :  { %902 = vmatpush1.bf16.msra.mxu0 %v2188_v56  ;;  %v2262_v56 = vld [vmem:[#allocation7 + $0x2e4] ss:$24 sps:$4 sm:$0xff]  }
  0xb5   :  { %903 = vmatprep.subr.bf16.mxu0 %v2196_v58  ;;  %v2263_v58 = vld [vmem:[#allocation10 + $0x40] sm:$0xff]  }
  0xb6   :  { %865 = vmatpush1.bf16.msra.mxu1 %v2199_v59  ;;  %v2264_v59 = vld [vmem:[#allocation10] sm:$0xff]  }
  0xb7   :  { %866 = vmatprep.subr.bf16.mxu1 %v2203_v63  ;;  %v2268_v63 = vld [vmem:[#allocation10 + $0x10] sm:$0xff]  }
  0xb8   :  { %904 = vmatpush1.bf16.msra.mxu0 %v2194_v60  ;;  %v2265_v60 = vld [vmem:[#allocation10 + $0x48] sm:$0xff]  }
  0xb9   :  { %905 = vmatprep.subr.bf16.mxu0 %v2202_v61  ;;  %v2266_v61 = vld [vmem:[#allocation10 + $0x8] sm:$0xff]  }
  0xba   :  { %867 = vmatpush1.bf16.msra.mxu1 %v2205_v0  ;;  %v2269_v0 = vld [vmem:[#allocation10 + $0x58] sm:$0xff]  }
  0xbb   :  { %868 = vmatprep.subr.bf16.mxu1 %v2209_v3  ;;  %v2272_v3 = vld [vmem:[#allocation10 + $0x20] sm:$0xff]  }
  0xbc   :  { %906 = vmatpush1.bf16.msra.mxu0 %v2200_v62  ;;  %v2267_v62 = vld [vmem:[#allocation10 + $0x50] sm:$0xff]  }
  0xbd   :  { %907 = vmatprep.subr.bf16.mxu0 %v2208_v1  ;;  %v2270_v1 = vld [vmem:[#allocation10 + $0x18] sm:$0xff]  }
  0xbe   :  { %869 = vmatpush1.bf16.msra.mxu1 %v2211_v4  ;;  %v2273_v4 = vld [vmem:[#allocation10 + $0x68] sm:$0xff]  }
  0xbf   :  { %920 = vmatprep.subr.bf16.mxu1 %v2217_v7  ;;  %v2276_v7 = vld [vmem:[#allocation10 + $0x30] sm:$0xff]  }
  0xc0   :  { %908 = vmatpush1.bf16.msra.mxu0 %v2206_v2  ;;  %v2271_v2 = vld [vmem:[#allocation10 + $0x60] sm:$0xff]  }
  0xc1   :  { %909 = vmatprep.subr.bf16.mxu0 %v2214_v6  ;;  %v2275_v6 = vld [vmem:[#allocation10 + $0x70] sm:$0xff]  }
  0xc4   :  { %910 = vmatpush1.bf16.msra.mxu0 %v2212_v5  ;;  %v2274_v5 = vld [vmem:[#allocation10 + $0x28] sm:$0xff]  }
 0x15a   :  { %v215_v15 = vpop.f32.mrb[0].mxu0 }
 0x15b   :  { %v216_v16 = vadd.f32 %v215_v15, %v150_v13  ;;  %v217_v17 = vpop.f32.mrb[1].mxu0  ;;  %v2279_v13 = vld [vmem:[#allocation11 + $0x40] sm:$0xff]   ;;  %v2281_v15 = vld [vmem:[#allocation11 + $0x48] sm:$0xff]  }
 0x15c   :  { %v218_v18 = vadd.f32 %v217_v17, %v154_v14  ;;  %v219_v19 = vpop.f32.mrb[2].mxu0  ;;  %v2280_v14 = vld [vmem:[#allocation11] sm:$0xff]   ;;  %1979 = vmatprep.subr.bf16.mxu0 %v2279_v13  ;;  %v2283_v17 = vld [vmem:[#allocation11 + $0x50] sm:$0xff]   ;;  %v2297_v13 = vld [vmem:[#allocation8 + $0x48] sm:$0xff]  }
 0x15d   :  { %vm222_vm1 = vcmp.gt.f32.partialorder %v216_v16, 0.0  ;;  %v224_v20 = vmul.f32 0.01, %v216_v16  ;;  %v220_v21 = vpop.f32.mrb[3].mxu0  ;;  %v2285_v19 = vld [vmem:[#allocation11 + $0x58] sm:$0xff]  }
 0x15e   :  { %vm223_vm2 = vcmp.gt.f32.partialorder %v218_v18, 0.0  ;;  %v225_v22 = vmul.f32 0.01, %v218_v18  ;;  %v2287_v21 = vld [vmem:[#allocation11 + $0x60] sm:$0xff]  }
 0x15f   :  { %v226_v23 = vsel %vm222_vm1, %v216_v16, %v224_v20  ;;  %v2282_v16 = vld [vmem:[#allocation11 + $0x8] sm:$0xff]   ;;  %v2286_v20 = vld [vmem:[#allocation11 + $0x18] sm:$0xff]  }
 0x160   :  { %v227_v24 = vsel %vm223_vm2, %v218_v18, %v225_v22  ;;  %v2715_v27 = vpack.c.bf16 %v226_v23, %v226_v23  ;;  %v2284_v18 = vld [vmem:[#allocation11 + $0x10] sm:$0xff]   ;;  %v2288_v22 = vld [vmem:[#allocation11 + $0x20] sm:$0xff]   ;;  %v2289_v23 = vld [vmem:[#allocation11 + $0x68] sm:$0xff]  }
 0x161   :  { %v229_v25 = vpack.c.bf16 %v227_v24, %v227_v24  ;;  %v2290_v24 = vld [vmem:[#allocation11 + $0x28] sm:$0xff]  }
 0x163   :  { %870 = vmatprep.mubr.bf16.mxu1 %v229_v25  ;;  %911 = vmatprep.mubr.bf16.mxu0 %v229_v25 }
 0x164   :  { %871 = vmatmul.mubr.bf16.vlgmr.msra.gmra.mrb[0].mxu1 %v2715_v27  ;;  %912 = vmatmul.mubr.bf16.vlgmr.msra.gmra.mrb[4].mxu0 %v2715_v27 }
 0x165   :  { %921 = vmatpush1.bf16.msra.mxu1 %v2215_v26  ;;  %952 = vmatprep.mubr.bf16.mxu1 %v229_v25  ;;  %v2291_v25 = vld [vmem:[#allocation11 + $0x70] sm:$0xff]  }
 0x166   :  { %922 = vmatprep.subr.bf16.mxu1 %v2220_v28  ;;  %1980 = vmatpush3.bf16.msra.mxu0 %v2280_v14  ;;  %v2292_v26 = vld [vmem:[#allocation11 + $0x30] sm:$0xff]   ;;  %v2294_v28 = vld [vmem:[#allocation11 + $0x38] sm:$0xff]  }
 0x167   :  { %1981 = vmatprep.subr.bf16.mxu0 %v2281_v15  ;;  %v2299_v15 = vld [vmem:[#allocation8 + $0x50] sm:$0xff]  }
 0x169   :  { %923 = vmatpush1.bf16.msra.mxu1 %v2218_v29  ;;  %v2295_v29 = vld [vmem:[#allocation8 + $0x40] sm:$0xff]  }
 0x16a   :  { %924 = vmatprep.subr.bf16.mxu1 %v2223_v30  ;;  %1982 = vmatpush3.bf16.msra.mxu0 %v2282_v16  ;;  %v2535_v30 = vmov 0.0   ;;  %v2300_v16 = vld [vmem:[#allocation8 + $0x10] sm:$0xff]  }
 0x16b   :  { %1983 = vmatprep.subr.bf16.mxu0 %v2283_v17  ;;  %v2301_v17 = vld [vmem:[#allocation8 + $0x58] sm:$0xff]  }
 0x16d   :  { %925 = vmatpush1.bf16.msra.mxu1 %v2221_v31  ;;  %v338_v31 = vsub.s32 2, %v2704_v9 }
 0x16e   :  { %926 = vmatprep.subr.bf16.mxu1 %v2226_v32  ;;  %1984 = vmatpush3.bf16.msra.mxu0 %v2284_v18  ;;  %v2725_v32 = vld [vmem:[%s2779_s4] sm:$0x3f] }
 0x16f   :  { %1985 = vmatprep.subr.bf16.mxu0 %v2285_v19  ;;  %v2302_v18 = vld [vmem:[#allocation8 + $0x18] sm:$0xff]   ;;  %v2303_v19 = vld [vmem:[#allocation8 + $0x60] sm:$0xff]  }
 0x171   :  { %927 = vmatpush1.bf16.msra.mxu1 %v2224_v33  ;;  %v342_v33 = vsub.s32 3, %v2704_v9 }
 0x172   :  { %928 = vmatprep.subr.bf16.mxu1 %v2229_v34  ;;  %1986 = vmatpush3.bf16.msra.mxu0 %v2286_v20  ;;  %v339_v34 = vrot.slane %v2725_v32, %v338_v31  ;;  %v2304_v20 = vld [vmem:[#allocation8 + $0x20] sm:$0xff]  }
 0x173   :  { %1987 = vmatprep.subr.bf16.mxu0 %v2287_v21  ;;  %v2305_v21 = vld [vmem:[#allocation8 + $0x68] sm:$0xff]  }
 0x175   :  { %929 = vmatpush1.bf16.msra.mxu1 %v2227_v35  ;;  %v343_v35 = vrot.slane %v2725_v32, %v342_v33  ;;  %v2318_v33 = vld [vmem:[#allocation13 + $0xb8] sm:$0xff]  }
 0x176   :  { %930 = vmatprep.subr.bf16.mxu1 %v2232_v36  ;;  %1988 = vmatpush3.bf16.msra.mxu0 %v2288_v22  ;;  %v2306_v22 = vld [vmem:[#allocation8 + $0x28] sm:$0xff]  }
 0x177   :  { %1989 = vmatprep.subr.bf16.mxu0 %v2289_v23  ;;  %v331_v23 = vrot.slane %v2725_v32, %v149_v10  ;;  %v2319_v10 = vld [vmem:[#allocation13 + $0x40] sm:$0xff]  }
 0x179   :  { %931 = vmatpush1.bf16.msra.mxu1 %v2230_v37 }
 0x17a   :  { %932 = vmatprep.subr.bf16.mxu1 %v2235_v38  ;;  %1990 = vmatpush3.bf16.msra.mxu0 %v2290_v24  ;;  %v2307_v24 = vld [vmem:[#allocation8 + $0x70] sm:$0xff]  }
 0x17b   :  { %1991 = vmatprep.subr.bf16.mxu0 %v2291_v25  ;;  %v2308_v25 = vld [vmem:[#allocation8 + $0x30] sm:$0xff]  }
 0x17d   :  { %933 = vmatpush1.bf16.msra.mxu1 %v2233_v39 }
 0x17e   :  { %934 = vmatprep.subr.bf16.mxu1 %v2238_v40  ;;  %1992 = vmatpush3.bf16.msra.mxu0 %v2292_v26 }
 0x181   :  { %935 = vmatpush1.bf16.msra.mxu1 %v2236_v41 }
 0x182   :  { %936 = vmatprep.subr.bf16.mxu1 %v2241_v42 }
 0x185   :  { %937 = vmatpush1.bf16.msra.mxu1 %v2239_v43 }
 0x186   :  { %938 = vmatprep.subr.bf16.mxu1 %v2244_v44 }
 0x189   :  { %939 = vmatpush1.bf16.msra.mxu1 %v2242_v45 }
 0x18a   :  { %940 = vmatprep.subr.bf16.mxu1 %v2247_v46 }
 0x18d   :  { %941 = vmatpush1.bf16.msra.mxu1 %v2245_v47 }
 0x18e   :  { %942 = vmatprep.subr.bf16.mxu1 %v2250_v48 }
 0x191   :  { %943 = vmatpush1.bf16.msra.mxu1 %v2248_v49  ;;  %v2311_v49 = vld [vmem:[#allocation13 + $0x80] sm:$0xff]  }
 0x192   :  { %944 = vmatprep.subr.bf16.mxu1 %v2253_v50 }
 0x195   :  { %945 = vmatpush1.bf16.msra.mxu1 %v2251_v51  ;;  %v2312_v51 = vld [vmem:[#allocation13 + $0x88] sm:$0xff]  }
 0x196   :  { %946 = vmatprep.subr.bf16.mxu1 %v2256_v52  ;;  %v2313_v52 = vld [vmem:[#allocation13 + $0x90] sm:$0xff]  }
 0x199   :  { %947 = vmatpush1.bf16.msra.mxu1 %v2254_v53  ;;  %v2314_v53 = vld [vmem:[#allocation13 + $0x98] sm:$0xff]  }
 0x19a   :  { %948 = vmatprep.subr.bf16.mxu1 %v2259_v54  ;;  %v2315_v54 = vld [vmem:[#allocation13 + $0xa0] sm:$0xff]  }
 0x19d   :  { %949 = vmatpush1.bf16.msra.mxu1 %v2257_v55  ;;  %v2316_v55 = vld [vmem:[#allocation13 + $0xa8] sm:$0xff]  }
 0x19e   :  { %950 = vmatprep.subr.bf16.mxu1 %v2262_v56  ;;  %v346_v56 = vsub.s32 4, %v2704_v9 }
 0x1a1   :  { %951 = vmatpush1.bf16.msra.mxu1 %v2260_v57  ;;  %v350_v57 = vsub.s32 5, %v2704_v9 }
 0x1a2   :  { %2023 = vmatprep.subr.bf16.mxu1 %v2263_v58  ;;  %v335_v58 = vrot.slane %v2725_v32, %v153_v12  ;;  %v2298_v12 = vld [vmem:[#allocation8 + $0x8] sm:$0xff]  }
 0x1a4   :  { %953 = vmatmul.mubr.bf16.vlgmr.msra.gmra.mrb[4].mxu1 %v2715_v27  ;;  %v2293_v27 = vld [vmem:[#allocation11 + $0x78] sm:$0xff]  }
 0x1a5   :  { %2024 = vmatpush3.bf16.msra.mxu1 %v2264_v59  ;;  %1993 = vmatprep.subr.bf16.mxu0 %v2293_v27  ;;  %v347_v59 = vrot.slane %v2725_v32, %v346_v56  ;;  %v2309_v27 = vld [vmem:[#allocation8 + $0x78] sm:$0xff]  }
 0x1a6   :  { %2025 = vmatprep.subr.bf16.mxu1 %v2265_v60  ;;  %1994 = vmatpush3.bf16.msra.mxu0 %v2294_v28  ;;  %v351_v60 = vrot.slane %v2725_v32, %v350_v57  ;;  %v2317_v28 = vld [vmem:[#allocation13 + $0xb0] sm:$0xff]   ;;  %v2320_v32 = vld [vmem:[#allocation13] sm:$0xff]  }
 0x1a7   :  { %2001 = vmatprep.subr.bf16.mxu0 %v2295_v29  ;;  %v2310_v29 = vld [vmem:[#allocation8 + $0x38] sm:$0xff]  }
 0x1a9   :  { %2026 = vmatpush3.bf16.msra.mxu1 %v2266_v61 }
 0x1aa   :  { %2027 = vmatprep.subr.bf16.mxu1 %v2267_v62 }
 0x1ad   :  { %2028 = vmatpush3.bf16.msra.mxu1 %v2268_v63 }
 0x1ae   :  { %2029 = vmatprep.subr.bf16.mxu1 %v2269_v0 }
 0x1b1   :  { %2030 = vmatpush3.bf16.msra.mxu1 %v2270_v1 }
 0x1b2   :  { %2031 = vmatprep.subr.bf16.mxu1 %v2271_v2 }
 0x1b5   :  { %2032 = vmatpush3.bf16.msra.mxu1 %v2272_v3 }
 0x1b6   :  { %2033 = vmatprep.subr.bf16.mxu1 %v2273_v4 }
 0x1b9   :  { %2034 = vmatpush3.bf16.msra.mxu1 %v2274_v5 }
 0x1ba   :  { %2035 = vmatprep.subr.bf16.mxu1 %v2275_v6 }
 0x1bd   :  { %2036 = vmatpush3.bf16.msra.mxu1 %v2276_v7 }
 0x1be   :  { %2037 = vmatprep.subr.bf16.mxu1 %v2277_v8  ;;  %v2296_v8 = vld [vmem:[#allocation8] sm:$0xff]  }
 0x1c1   :  { %2038 = vmatpush3.bf16.msra.mxu1 %v2278_v11 }
 0x1c2   :  { %2076 = vmatprep.subr.bf16.mxu1 %v2535_v30 }
 0x237   :  { %v2730_v36 = vpop.f32.mrb[0].mxu1  ;;  %v913_v37 = vpop.f32.mrb[4].mxu0 }
 0x238   :  { %v914_v38 = vadd.f32 %v913_v37, %v339_v34  ;;  %v874_v39 = vpop.f32.mrb[1].mxu1  ;;  %v915_v40 = vpop.f32.mrb[5].mxu0  ;;  %v873_v26 = vadd.f32 %v2730_v36, %v331_v23  ;;  %v2321_v34 = vld [vmem:[#allocation13 + $0x48] sm:$0xff]   ;;  %v2323_v36 = vld [vmem:[#allocation13 + $0x50] sm:$0xff]  }
 0x239   :  { %v916_v41 = vadd.f32 %v915_v40, %v343_v35  ;;  %v876_v42 = vpop.f32.mrb[2].mxu1  ;;  %v917_v43 = vpop.f32.mrb[6].mxu0  ;;  %v875_v61 = vadd.f32 %v874_v39, %v335_v58  ;;  %v2322_v35 = vld [vmem:[#allocation13 + $0x8] sm:$0xff]   ;;  %v2324_v37 = vld [vmem:[#allocation13 + $0x10] sm:$0xff]   ;;  %v2326_v39 = vld [vmem:[#allocation13 + $0x18] sm:$0xff]  }
 0x23a   :  { %v963_v44 = vmax.f32 %v914_v38, 0.0  ;;  %v877_v45 = vpop.f32.mrb[3].mxu1  ;;  %v918_v46 = vpop.f32.mrb[7].mxu0  ;;  %v961_v31 = vmax.f32 %v873_v26, 0.0  ;;  %v2325_v38 = vld [vmem:[#allocation13 + $0x58] sm:$0xff]   ;;  %v2327_v40 = vld [vmem:[#allocation13 + $0x60] sm:$0xff]  }
 0x23b   :  { %v964_v47 = vmax.f32 %v916_v41, 0.0  ;;  %v962_v5 = vmax.f32 %v875_v61, 0.0  ;;  %v2329_v41 = vld [vmem:[#allocation13 + $0x68] sm:$0xff]   ;;  %v2331_v43 = vld [vmem:[#allocation13 + $0x70] sm:$0xff]   ;;  %v2333_v45 = vld [vmem:[#allocation13 + $0x78] sm:$0xff]  }
 0x23c   :  { %v969_v50 = vpack.c.bf16 %v963_v44, %v963_v44  ;;  %v967_v9 = vpack.c.bf16 %v961_v31, %v961_v31  ;;  %v2330_v42 = vld [vmem:[#allocation13 + $0x28] sm:$0xff]   ;;  %v2332_v44 = vld [vmem:[#allocation13 + $0x30] sm:$0xff]   ;;  %v2334_v46 = vld [vmem:[#allocation13 + $0x38] sm:$0xff]  }
 0x23d   :  { %v970_v48 = vpack.c.bf16 %v964_v47, %v964_v47  ;;  %v968_v14 = vpack.c.bf16 %v962_v5, %v962_v5  ;;  %v1903_v61 = vld [vmem:[%s2785_s10] ss:$0 sm:$0xff] }
 0x23f   :  { %1490 = vmatprep.mubr.bf16.mxu1 %v970_v48  ;;  %v1937_v48 = vld [vmem:[%s2783_s8] ss:$0 sm:$0xff] }
 0x240   :  { %1491 = vmatmul.mubr.bf16.vlgmr.msra.gmra.mrb[8].mxu1 %v969_v50 }
 0x241   :  { %2077 = vmatpush3.bf16.msra.mxu1 %v2311_v49  ;;  %2092 = vmatprep.mubr.msk.bf16.mxu1 %vm2536_vm3, %v2535_v30 }
 0x242   :  { %2078 = vmatprep.subr.bf16.mxu1 %v2535_v30 }
 0x245   :  { %2079 = vmatpush3.bf16.msra.mxu1 %v2312_v51 }
 0x246   :  { %2080 = vmatprep.subr.bf16.mxu1 %v2535_v30 }
 0x249   :  { %2081 = vmatpush3.bf16.msra.mxu1 %v2313_v52 }
 0x24a   :  { %2082 = vmatprep.subr.bf16.mxu1 %v2535_v30 }
 0x24d   :  { %2083 = vmatpush3.bf16.msra.mxu1 %v2314_v53 }
 0x24e   :  { %2084 = vmatprep.subr.bf16.mxu1 %v2535_v30 }
 0x251   :  { %2085 = vmatpush3.bf16.msra.mxu1 %v2315_v54 }
 0x252   :  { %2086 = vmatprep.subr.bf16.mxu1 %v2535_v30 }
 0x255   :  { %2087 = vmatpush3.bf16.msra.mxu1 %v2316_v55 }
 0x256   :  { %2088 = vmatprep.subr.bf16.mxu1 %v2535_v30 }
 0x259   :  { %2089 = vmatpush3.bf16.msra.mxu1 %v2317_v28 }
 0x25a   :  { %2090 = vmatprep.subr.bf16.mxu1 %v2535_v30  ;;  %v2328_v30 = vld [vmem:[#allocation13 + $0x20] sm:$0xff]  }
 0x25d   :  { %2091 = vmatpush3.bf16.msra.mxu1 %v2318_v33 }
 0x277   :  { %v954_v62 = vpop.f32.mrb[4].mxu1 }
 0x278   :  { %v955_v63 = vadd.f32 %v954_v62, %v347_v59  ;;  %v956_v0 = vpop.f32.mrb[5].mxu1 }
 0x279   :  { %v957_v1 = vadd.f32 %v956_v0, %v351_v60  ;;  %v958_v2 = vpop.f32.mrb[6].mxu1  ;;  %v1920_v0 = vld [vmem:[%s2781_s6] ss:$0 sm:$0xff]  ;;  %s2537_s6 = smov [#allocation14]  }
 0x27a   :  { %v965_v3 = vmax.f32 %v955_v63, 0.0  ;;  %v959_v4 = vpop.f32.mrb[7].mxu1  ;;  %s1790_s5 = sshll.u32 %s2537_s6, 4  ;;  %s1791_s5 = int_to_ptr.vmem [resolvable:$true] %s1790_s5 }
 0x27b   :  { %v966_v6 = vmax.f32 %v957_v1, 0.0  ;;  %s2489_s23 = scalar_lea.vmem %s1791_s5, 128  ;;  %p2494_p1 = scmp.lt.s32.totalorder %s1791_s5, %s1791_s5 }
 0x27c   :  { %v971_v11 = vpack.c.bf16 %v965_v3, %v965_v3  ;;  %p2490_p0 = scmp.ne.s32.totalorder %s1791_s5, %s2489_s23  ;;  %p2495_p2 = scmp.lt.s32.totalorder %s2489_s23, %s2489_s23 }
 0x27d   :  { %v972_v7 = vpack.c.bf16 %v966_v6, %v966_v6 }
 0x27e   :  { %p2496_p3 = por %p2495_p2, %p2494_p1 }
 0x27f   :  { %1140 = vmatprep.mubr.bf16.mxu0 %v972_v7 }
 0x280   :  { %1141 = vmatmul.mubr.bf16.vlgmr.msra.gmra.mrb[8].mxu0 %v971_v11  ;;  %p2497_p4 = pnand %p2496_p3, %p2490_p0 }
 0x281   :  { %2002 = vmatpush3.bf16.msra.mxu0 %v2296_v8  ;;  %1315 = vmatprep.mubr.bf16.mxu0 %v968_v14 }
 0x282   :  { %2003 = vmatprep.subr.bf16.mxu0 %v2297_v13 }
 0x285   :  { %2004 = vmatpush3.bf16.msra.mxu0 %v2298_v12 }
 0x286   :  { %2005 = vmatprep.subr.bf16.mxu0 %v2299_v15 }
 0x289   :  { %2006 = vmatpush3.bf16.msra.mxu0 %v2300_v16 }
 0x28a   :  { %2007 = vmatprep.subr.bf16.mxu0 %v2301_v17  ;;  %v1954_v17 = vld [vmem:[%s2787_s12] ss:$0 sm:$0xff] }
 0x28d   :  { %2008 = vmatpush3.bf16.msra.mxu0 %v2302_v18 }
 0x28e   :  { %2009 = vmatprep.subr.bf16.mxu0 %v2303_v19 }
 0x291   :  { %2010 = vmatpush3.bf16.msra.mxu0 %v2304_v20 }
 0x292   :  { %2011 = vmatprep.subr.bf16.mxu0 %v2305_v21 }
 0x295   :  { %2012 = vmatpush3.bf16.msra.mxu0 %v2306_v22 }
 0x296   :  { %2013 = vmatprep.subr.bf16.mxu0 %v2307_v24 }
 0x299   :  { %2014 = vmatpush3.bf16.msra.mxu0 %v2308_v25 }
 0x29a   :  { %2015 = vmatprep.subr.bf16.mxu0 %v2309_v27 }
 0x29d   :  { %2016 = vmatpush3.bf16.msra.mxu0 %v2310_v29 }
 0x29e   :  { %2045 = vmatprep.subr.bf16.mxu0 %v2319_v10 }
 0x2a0   :  { %1316 = vmatmul.mubr.bf16.vlgmr.msra.gmra.mrb[12].mxu0 %v967_v9 }
 0x2a1   :  { %2046 = vmatpush3.bf16.msra.mxu0 %v2320_v32 }
 0x2a2   :  { %2047 = vmatprep.subr.bf16.mxu0 %v2321_v34 }
 0x2a5   :  { %2048 = vmatpush3.bf16.msra.mxu0 %v2322_v35 }
 0x2a6   :  { %2049 = vmatprep.subr.bf16.mxu0 %v2323_v36 }
 0x2a9   :  { %2050 = vmatpush3.bf16.msra.mxu0 %v2324_v37 }
 0x2aa   :  { %2051 = vmatprep.subr.bf16.mxu0 %v2325_v38 }
 0x2ad   :  { %2052 = vmatpush3.bf16.msra.mxu0 %v2326_v39 }
 0x2ae   :  { %2053 = vmatprep.subr.bf16.mxu0 %v2327_v40 }
 0x2b1   :  { %2054 = vmatpush3.bf16.msra.mxu0 %v2328_v30 }
 0x2b2   :  { %2055 = vmatprep.subr.bf16.mxu0 %v2329_v41 }
 0x2b5   :  { %2056 = vmatpush3.bf16.msra.mxu0 %v2330_v42 }
 0x2b6   :  { %2057 = vmatprep.subr.bf16.mxu0 %v2331_v43 }
 0x2b9   :  { %2058 = vmatpush3.bf16.msra.mxu0 %v2332_v44 }
 0x2ba   :  { %2059 = vmatprep.subr.bf16.mxu0 %v2333_v45 }
 0x2bd   :  { %2060 = vmatpush3.bf16.msra.mxu0 %v2334_v46 }
 0x313   :  { %v2039_v47 = vpop.f32.mrb[8].mxu1 }
 0x314   :  { %v2040_v49 = vpop.f32.mrb[9].mxu1 }
 0x315   :  { %v2041_v50 = vadd.f32 %v2040_v49, %v2039_v47  ;;  %v2042_v51 = vpop.f32.mrb[10].mxu1 }
 0x316   :  { %v2043_v52 = vpop.f32.mrb[11].mxu1 }
 0x317   :  { %v1493_v53 = vadd.f32 %v2041_v50, %v1937_v48 }
 0x319   :  { %v1502_v54 = vmax.f32 %v1493_v53, 0.0 }
 0x31b   :  { %v1503_v55 = vpack.c.bf16 %v1502_v54, %v1502_v54 }
 0x31d   :  { %2093 = vmatmul.mubr.bf16.vlgmr.msra.gmra.mrb[12].mxu1 %v1503_v55 }
 0x353   :  { %v1995_v56 = vpop.f32.mrb[8].mxu0 }
 0x354   :  { %v1996_v57 = vpop.f32.mrb[9].mxu0 }
 0x355   :  { %v1997_v58 = vadd.f32 %v1996_v57, %v1995_v56  ;;  %v1998_v59 = vpop.f32.mrb[10].mxu0 }
 0x356   :  { %v1999_v60 = vpop.f32.mrb[11].mxu0 }
 0x357   :  { %v1143_v63 = vadd.f32 %v1997_v58, %v1903_v61 }
 0x359   :  { %v1498_v6 = vmax.f32 %v1143_v63, 0.0 }
 0x35b   :  { %v1499_v11 = vpack.c.bf16 %v1498_v6, %v1498_v6 }
 0x373   :  { %v2017_v62 = vpop.f32.mrb[12].mxu0 }
 0x374   :  { %v2018_v1 = vpop.f32.mrb[13].mxu0 }
 0x375   :  { %v2019_v2 = vadd.f32 %v2018_v1, %v2017_v62  ;;  %v2020_v3 = vpop.f32.mrb[14].mxu0 }
 0x376   :  { %v2021_v4 = vpop.f32.mrb[15].mxu0 }
 0x377   :  { %v1318_v5 = vadd.f32 %v2019_v2, %v1920_v0 }
 0x379   :  { %v1500_v7 = vmax.f32 %v1318_v5, 0.0 }
 0x37b   :  { %v1501_v8 = vpack.c.bf16 %v1500_v7, %v1500_v7 }
 0x37d   :  { %1735 = vmatprep.mubr.bf16.mxu0 %v1501_v8 }
 0x37e   :  { %1736 = vmatmul.mubr.bf16.vlgmr.msra.gmra.mrb[16].mxu0 %v1499_v11 }
 0x3f0   :  { %v1777_v13 = vpop.f32.mrb[12].mxu1 }
 0x3f1   :  { %v2094_v14 = vpop.f32.mrb[13].mxu1 }
 0x3f2   :  { %v1780_v12 = vpop.f32.mrb[14].mxu1 }
 0x3f3   :  { %v2095_v15 = vpop.f32.mrb[15].mxu1 }
 0x451   :  { %v2061_v16 = vpop.f32.mrb[16].mxu0 }
 0x452   :  { %v2062_v18 = vpop.f32.mrb[17].mxu0 }
 0x453   :  { %v2063_v19 = vadd.f32 %v2062_v18, %v2061_v16  ;;  %v2064_v20 = vpop.f32.mrb[18].mxu0 }
 0x454   :  { %v2065_v21 = vpop.f32.mrb[19].mxu0 }
 0x455   :  { %v1738_v22 = vadd.f32 %v2063_v19, %v1954_v17 }
 0x457   :  { %v1778_v23 = vadd.f32 %v1777_v13, %v1738_v22 }
 0x459   :  { %1783 = vst [vmem:[#allocation14] sm:$0xff] %v1778_v23 }
 0x45a   :  { %2500 = shalt.err (!%p2497_p4)
}
 0x45b   :  { %s2501_s12 = scalar_lea.hbm %s2788_s13, 128 }
 0x45c   :  { %p2502_p5 = scmp.ne.s32.totalorder %s2788_s13, %s2501_s12  ;;  %p2505_p6 = scmp.lt.u32.totalorder %s2501_s12, %s2788_s13 }
 0x45e   :  { %p2507_p7 = pnand %p2505_p6, %p2502_p5 }
 0x460   :  { %2510 = shalt.err (!%p2507_p7)
}
 0x461   :  { %1793 = dma.vmem_to_hbm [thread:$0]  %s1791_s5, 128, %s2788_s13, [#allocation4]  }
 0x462   :  { %2519 = dma.done.wait [#allocation4], 128  }
 0x463   :  { %2520 = vsyncadd [#allocation4], 4294967168 }
 0x464   :  { %1797 = vsyncpa [#allocation3], 1 }
 0x465   :  { %1798 = vsyncpa [#allocation6], 1 }
 0x466   :  { %1799 = vsyncpa [#allocation9], 1 }
 0x467   :  { %1800 = vsyncpa [#allocation12], 1 }
 0x468   :  { %1801 = vsyncpa [#allocation4], 1 }

</bundles_post_ra>
